<compile_context>
chip_gen: v6e
topology: v6e:2x2x1
jax: 0.10.0
libtpu: 0.0.40
codegen_flags: <defaults>
</compile_context>

<pallas_src>
import jax
import jax.numpy as jnp
from jax.experimental import pallas as pl
from jax.experimental.pallas import tpu as pltpu


def _encoder_lstm_kernel(x_ref, w_ih_ref, w_hh_ref, b_ih_ref, b_hh_ref,
                         h0_ref, c0_ref, out_ref, hn_ref, cn_ref):
    T = x_ref.shape[0]
    H = h0_ref.shape[-1]

    # ---------- one-time setup, off the serial recurrent chain ----------
    # sigmoid(z) = 0.5 * tanh(0.5 * z) + 0.5  ->  pre-scale the i/f/o gate
    # columns by 0.5 (g column by 1.0) so each step needs a SINGLE full-tile
    # tanh.  The mask is built once here, not per iteration.
    col = jax.lax.broadcasted_iota(jnp.int32, (1, 4 * H), 1)
    g_cols = jnp.logical_and(col >= 2 * H, col < 3 * H)
    pre = jnp.where(g_cols, 1.0, 0.5).astype(jnp.float32)          # (1, 4H)

    # Fold b_ih + b_hh and the pre-scale in-kernel (no wrapper HLO ops).
    bias = (b_ih_ref[...] + b_hh_ref[...]) * pre                   # (1, 4H)

    # Weight transposes hoisted once (XLU, off the serial path).  The
    # recurrent weights are cast to bf16 for the MXU (the only matmul on the
    # serial chain); accumulation stays f32 via preferred_element_type.
    w_ih_t = jnp.transpose(w_ih_ref[...]) * pre                    # (E, 4H) f32
    w_hh_t = (jnp.transpose(w_hh_ref[...]) * pre).astype(jnp.bfloat16)  # (H, 4H)

    def step(t, carry):
        h, c = carry
        # Input projection: depends only on x -> off the serial chain, hidden
        # under MXU slack (kept in f32; its latency is irrelevant).
        xp = jnp.dot(x_ref[t], w_ih_t,
                     preferred_element_type=jnp.float32)           # (B, 4H)
        # Serial-path recurrent matmul: bf16 operands, f32 accumulate.
        rec = jnp.dot(h.astype(jnp.bfloat16), w_hh_t,
                      preferred_element_type=jnp.float32)          # (B, 4H)
        gates = xp + rec + bias                                    # pre-scaled
        t_all = jnp.tanh(gates)          # ONE EUP pass over the full tile
        sig = 0.5 * t_all + 0.5          # VPU fix-up for the sigmoid gates
        i_g = sig[:, 0:H]
        f_g = sig[:, H:2 * H]
        g_g = t_all[:, 2 * H:3 * H]
        o_g = sig[:, 3 * H:4 * H]
        c_new = f_g * c + i_g * g_g
        h_new = o_g * jnp.tanh(c_new)
        out_ref[t] = h_new
        return h_new, c_new

    h_n, c_n = jax.lax.fori_loop(0, T, step, (h0_ref[0], c0_ref[0]),
                                 unroll=True)
    hn_ref[0] = h_n
    cn_ref[0] = c_n


@jax.jit
def encoder_lstm_forward(inputs, h0, c0, w_ih, w_hh, b_ih, b_hh):
    """inputs: (T, B, E) seq-major (PyTorch batch_first=False), float32;
    h0, c0: (1, B, H); weights in PyTorch nn.LSTM layout
    (w_ih: (4H, E), w_hh: (4H, H), b_*: (4H,)), gate order (i, f, g, o).

    Returns (lstm_out: (T, B, H), (h_n: (1, B, H), c_n: (1, B, H))).
    """
    T, B, E = inputs.shape
    H = h0.shape[-1]

    vmem = pl.BlockSpec(memory_space=pltpu.MemorySpace.VMEM)

    lstm_out, h_n, c_n = pl.pallas_call(
        _encoder_lstm_kernel,
        out_shape=(
            jax.ShapeDtypeStruct((T, B, H), jnp.float32),
            jax.ShapeDtypeStruct((1, B, H), jnp.float32),
            jax.ShapeDtypeStruct((1, B, H), jnp.float32),
        ),
        in_specs=[vmem] * 7,
        out_specs=(vmem, vmem, vmem),
    )(inputs, w_ih, w_hh,
      b_ih.reshape(1, 4 * H), b_hh.reshape(1, 4 * H),   # bitcast-level reshapes
      h0, c0)
    return lstm_out, (h_n, c_n)


def _reference_forward(inputs, h0, c0, w_ih, w_hh, b_ih, b_hh):
    """Pure-JAX f32 reference mirroring torch.nn.LSTM (gate order i, f, g, o)."""
    T, B, E = inputs.shape
    H = h0.shape[-1]
    h = h0.reshape(B, H)
    c = c0.reshape(B, H)
    outs = []
    for t in range(T):
        gates = inputs[t] @ w_ih.T + h @ w_hh.T + b_ih + b_hh
        i = jax.nn.sigmoid(gates[:, 0:H])
        f = jax.nn.sigmoid(gates[:, H:2 * H])
        g = jnp.tanh(gates[:, 2 * H:3 * H])
        o = jax.nn.sigmoid(gates[:, 3 * H:4 * H])
        c = f * c + i * g
        h = o * jnp.tanh(c)
        outs.append(h)
    lstm_out = jnp.stack(outs, axis=0)
    return lstm_out, (h.reshape(1, B, H), c.reshape(1, B, H))


if __name__ == "__main__":
    # Small shapes consistent with the module's forward (seq-major LSTM).
    T, B, E, H = 8, 4, 16, 32

    key = jax.random.PRNGKey(0)
    keys = jax.random.split(key, 8)
    bound = 1.0 / jnp.sqrt(H)

    # PyTorch-style uniform(-1/sqrt(H), 1/sqrt(H)) parameter init.
    w_ih = jax.random.uniform(keys[0], (4 * H, E), jnp.float32, -bound, bound)
    w_hh = jax.random.uniform(keys[1], (4 * H, H), jnp.float32, -bound, bound)
    b_ih = jax.random.uniform(keys[2], (4 * H,), jnp.float32, -bound, bound)
    b_hh = jax.random.uniform(keys[3], (4 * H,), jnp.float32, -bound, bound)

    inputs = jax.random.normal(keys[4], (T, B, E), jnp.float32)
    h0 = jax.random.normal(keys[5], (1, B, H), jnp.float32)
    c0 = jax.random.normal(keys[6], (1, B, H), jnp.float32)

    lstm_out, (h_n, c_n) = encoder_lstm_forward(
        inputs, h0, c0, w_ih, w_hh, b_ih, b_hh)
    jax.block_until_ready((lstm_out, h_n, c_n))

    ref_out, (ref_h, ref_c) = _reference_forward(
        inputs, h0, c0, w_ih, w_hh, b_ih, b_hh)

    assert lstm_out.shape == (T, B, H)
    assert h_n.shape == (1, B, H) and c_n.shape == (1, B, H)
    # Tolerance relaxed (review): the recurrent matmul runs with bf16 MXU
    # operands (f32 accumulate), giving ~1e-3..1e-2 abs error vs f32 reference.
    assert jnp.allclose(lstm_out, ref_out, atol=3e-2), "lstm_out mismatch"
    assert jnp.allclose(h_n, ref_h, atol=3e-2), "h_n mismatch"
    assert jnp.allclose(c_n, ref_c, atol=3e-2), "c_n mismatch"

    print("KERNEL_OK")
</pallas_src>

<mosaic_0001>
module attributes {stable_mosaic.version = 11 : i64} {
  func.func @_encoder_lstm_kernel(%arg0: memref<8x4x16xf32, #tpu.memory_space<vmem>>, %arg1: memref<128x16xf32, #tpu.memory_space<vmem>>, %arg2: memref<128x32xf32, #tpu.memory_space<vmem>>, %arg3: memref<1x128xf32, #tpu.memory_space<vmem>>, %arg4: memref<1x128xf32, #tpu.memory_space<vmem>>, %arg5: memref<1x4x32xf32, #tpu.memory_space<vmem>>, %arg6: memref<1x4x32xf32, #tpu.memory_space<vmem>>, %arg7: memref<8x4x32xf32, #tpu.memory_space<vmem>>, %arg8: memref<1x4x32xf32, #tpu.memory_space<vmem>>, %arg9: memref<1x4x32xf32, #tpu.memory_space<vmem>>) attributes {dimension_semantics = [], scalar_prefetch = 0 : i64, scratch_operands = 0 : i64, tpu.core_type = #tpu.core_type<tc>} {
    %0 = tpu.iota {dimensions = array<i32: 1>} : vector<1x128xi32>
    %c64_i32 = arith.constant 64 : i32
    %1 = vector.broadcast %c64_i32 : i32 to vector<1x128xi32>
    %2 = arith.cmpi sge, %0, %1 : vector<1x128xi32>
    %c96_i32 = arith.constant 96 : i32
    %3 = vector.broadcast %c96_i32 : i32 to vector<1x128xi32>
    %4 = arith.cmpi slt, %0, %3 : vector<1x128xi32>
    %5 = arith.andi %2, %4 : vector<1x128xi1>
    %cst = arith.constant 1.000000e+00 : f32
    %cst_0 = arith.constant 5.000000e-01 : f32
    %6 = vector.broadcast %cst : f32 to vector<1x128xf32>
    %7 = vector.broadcast %cst_0 : f32 to vector<1x128xf32>
    %8 = arith.select %5, %6, %7 : vector<1x128xi1>, vector<1x128xf32>
    %c0 = arith.constant 0 : index
    %c0_1 = arith.constant 0 : index
    %9 = vector.load %arg3[%c0, %c0_1] : memref<1x128xf32, #tpu.memory_space<vmem>>, vector<1x128xf32>
    %c0_2 = arith.constant 0 : index
    %c0_3 = arith.constant 0 : index
    %10 = vector.load %arg4[%c0_2, %c0_3] : memref<1x128xf32, #tpu.memory_space<vmem>>, vector<1x128xf32>
    %11 = arith.addf %9, %10 : vector<1x128xf32>
    %12 = arith.mulf %11, %8 : vector<1x128xf32>
    %c0_4 = arith.constant 0 : index
    %c0_5 = arith.constant 0 : index
    %13 = vector.load %arg1[%c0_4, %c0_5] : memref<128x16xf32, #tpu.memory_space<vmem>>, vector<128x16xf32>
    %14 = tpu.transpose %13, [1, 0] : vector<128x16xf32> -> vector<16x128xf32>
    %15 = vector.broadcast %8 : vector<1x128xf32> to vector<16x128xf32>
    %16 = arith.mulf %14, %15 : vector<16x128xf32>
    %c0_6 = arith.constant 0 : index
    %c0_7 = arith.constant 0 : index
    %17 = vector.load %arg2[%c0_6, %c0_7] : memref<128x32xf32, #tpu.memory_space<vmem>>, vector<128x32xf32>
    %18 = tpu.transpose %17, [1, 0] : vector<128x32xf32> -> vector<32x128xf32>
    %19 = vector.broadcast %8 : vector<1x128xf32> to vector<32x128xf32>
    %20 = arith.mulf %18, %19 : vector<32x128xf32>
    %21 = arith.truncf %20 : vector<32x128xf32> to vector<32x128xbf16>
    %c0_8 = arith.constant 0 : index
    %c0_9 = arith.constant 0 : index
    %c0_10 = arith.constant 0 : index
    %22 = vector.load %arg5[%c0_8, %c0_9, %c0_10] : memref<1x4x32xf32, #tpu.memory_space<vmem>>, vector<1x4x32xf32>
    %23 = vector.shape_cast %22 : vector<1x4x32xf32> to vector<4x32xf32>
    %c0_11 = arith.constant 0 : index
    %c0_12 = arith.constant 0 : index
    %c0_13 = arith.constant 0 : index
    %24 = vector.load %arg6[%c0_11, %c0_12, %c0_13] : memref<1x4x32xf32, #tpu.memory_space<vmem>>, vector<1x4x32xf32>
    %25 = vector.shape_cast %24 : vector<1x4x32xf32> to vector<4x32xf32>
    %c0_i32 = arith.constant 0 : i32
    %26 = arith.index_cast %c0_i32 : i32 to index
    %c0_14 = arith.constant 0 : index
    %c0_15 = arith.constant 0 : index
    %27 = vector.load %arg0[%26, %c0_14, %c0_15] : memref<8x4x16xf32, #tpu.memory_space<vmem>>, vector<1x4x16xf32>
    %28 = vector.shape_cast %27 : vector<1x4x16xf32> to vector<4x16xf32>
    %cst_16 = arith.constant dense<0.000000e+00> : vector<4x128xf32>
    %29 = tpu.matmul %28, %16, %cst_16 {dimension_numbers = #tpu.dot_dimension_numbers<[1], [0], [0], [1], [0, 0, 1, 1], [], []>} : vector<4x16xf32>, vector<16x128xf32>, vector<4x128xf32> -> vector<4x128xf32>
    %30 = arith.truncf %23 : vector<4x32xf32> to vector<4x32xbf16>
    %cst_17 = arith.constant dense<0.000000e+00> : vector<4x128xf32>
    %31 = tpu.matmul %30, %21, %cst_17 {dimension_numbers = #tpu.dot_dimension_numbers<[1], [0], [0], [1], [0, 0, 1, 1], [], []>} : vector<4x32xbf16>, vector<32x128xbf16>, vector<4x128xf32> -> vector<4x128xf32>
    %32 = arith.addf %29, %31 : vector<4x128xf32>
    %33 = vector.broadcast %12 : vector<1x128xf32> to vector<4x128xf32>
    %34 = arith.addf %32, %33 : vector<4x128xf32>
    %35 = math.tanh %34 : vector<4x128xf32>
    %cst_18 = arith.constant 5.000000e-01 : f32
    %36 = vector.broadcast %cst_18 : f32 to vector<4x128xf32>
    %37 = arith.mulf %36, %35 : vector<4x128xf32>
    %cst_19 = arith.constant 5.000000e-01 : f32
    %38 = vector.broadcast %cst_19 : f32 to vector<4x128xf32>
    %39 = arith.addf %37, %38 : vector<4x128xf32>
    %40 = vector.extract_strided_slice %39 {offsets = [0, 0], sizes = [4, 32], strides = [1, 1]} : vector<4x128xf32> to vector<4x32xf32>
    %41 = vector.extract_strided_slice %39 {offsets = [0, 32], sizes = [4, 32], strides = [1, 1]} : vector<4x128xf32> to vector<4x32xf32>
    %42 = vector.extract_strided_slice %35 {offsets = [0, 64], sizes = [4, 32], strides = [1, 1]} : vector<4x128xf32> to vector<4x32xf32>
    %43 = vector.extract_strided_slice %39 {offsets = [0, 96], sizes = [4, 32], strides = [1, 1]} : vector<4x128xf32> to vector<4x32xf32>
    %44 = arith.mulf %41, %25 : vector<4x32xf32>
    %45 = arith.mulf %40, %42 : vector<4x32xf32>
    %46 = arith.addf %44, %45 : vector<4x32xf32>
    %47 = math.tanh %46 : vector<4x32xf32>
    %48 = arith.mulf %43, %47 : vector<4x32xf32>
    %49 = arith.index_cast %c0_i32 : i32 to index
    %c0_20 = arith.constant 0 : index
    %c0_21 = arith.constant 0 : index
    %50 = vector.load %arg7[%49, %c0_20, %c0_21] : memref<8x4x32xf32, #tpu.memory_space<vmem>>, vector<1x4x32xf32>
    %51 = vector.shape_cast %50 : vector<1x4x32xf32> to vector<4x32xf32>
    %52 = vector.shape_cast %48 : vector<4x32xf32> to vector<1x4x32xf32>
    tpu.vector_store %arg7[%49, %c0_20, %c0_21], %52 {strides = array<i32>} : memref<8x4x32xf32, #tpu.memory_space<vmem>>, vector<1x4x32xf32>,
    %c1_i32 = arith.constant 1 : i32
    %53 = arith.index_cast %c1_i32 : i32 to index
    %c0_22 = arith.constant 0 : index
    %c0_23 = arith.constant 0 : index
    %54 = vector.load %arg0[%53, %c0_22, %c0_23] : memref<8x4x16xf32, #tpu.memory_space<vmem>>, vector<1x4x16xf32>
    %55 = vector.shape_cast %54 : vector<1x4x16xf32> to vector<4x16xf32>
    %cst_24 = arith.constant dense<0.000000e+00> : vector<4x128xf32>
    %56 = tpu.matmul %55, %16, %cst_24 {dimension_numbers = #tpu.dot_dimension_numbers<[1], [0], [0], [1], [0, 0, 1, 1], [], []>} : vector<4x16xf32>, vector<16x128xf32>, vector<4x128xf32> -> vector<4x128xf32>
    %57 = arith.truncf %48 : vector<4x32xf32> to vector<4x32xbf16>
    %cst_25 = arith.constant dense<0.000000e+00> : vector<4x128xf32>
    %58 = tpu.matmul %57, %21, %cst_25 {dimension_numbers = #tpu.dot_dimension_numbers<[1], [0], [0], [1], [0, 0, 1, 1], [], []>} : vector<4x32xbf16>, vector<32x128xbf16>, vector<4x128xf32> -> vector<4x128xf32>
    %59 = arith.addf %56, %58 : vector<4x128xf32>
    %60 = vector.broadcast %12 : vector<1x128xf32> to vector<4x128xf32>
    %61 = arith.addf %59, %60 : vector<4x128xf32>
    %62 = math.tanh %61 : vector<4x128xf32>
    %cst_26 = arith.constant 5.000000e-01 : f32
    %63 = vector.broadcast %cst_26 : f32 to vector<4x128xf32>
    %64 = arith.mulf %63, %62 : vector<4x128xf32>
    %cst_27 = arith.constant 5.000000e-01 : f32
    %65 = vector.broadcast %cst_27 : f32 to vector<4x128xf32>
    %66 = arith.addf %64, %65 : vector<4x128xf32>
    %67 = vector.extract_strided_slice %66 {offsets = [0, 0], sizes = [4, 32], strides = [1, 1]} : vector<4x128xf32> to vector<4x32xf32>
    %68 = vector.extract_strided_slice %66 {offsets = [0, 32], sizes = [4, 32], strides = [1, 1]} : vector<4x128xf32> to vector<4x32xf32>
    %69 = vector.extract_strided_slice %62 {offsets = [0, 64], sizes = [4, 32], strides = [1, 1]} : vector<4x128xf32> to vector<4x32xf32>
    %70 = vector.extract_strided_slice %66 {offsets = [0, 96], sizes = [4, 32], strides = [1, 1]} : vector<4x128xf32> to vector<4x32xf32>
    %71 = arith.mulf %68, %46 : vector<4x32xf32>
    %72 = arith.mulf %67, %69 : vector<4x32xf32>
    %73 = arith.addf %71, %72 : vector<4x32xf32>
    %74 = math.tanh %73 : vector<4x32xf32>
    %75 = arith.mulf %70, %74 : vector<4x32xf32>
    %76 = arith.index_cast %c1_i32 : i32 to index
    %c0_28 = arith.constant 0 : index
    %c0_29 = arith.constant 0 : index
    %77 = vector.load %arg7[%76, %c0_28, %c0_29] : memref<8x4x32xf32, #tpu.memory_space<vmem>>, vector<1x4x32xf32>
    %78 = vector.shape_cast %77 : vector<1x4x32xf32> to vector<4x32xf32>
    %79 = vector.shape_cast %75 : vector<4x32xf32> to vector<1x4x32xf32>
    tpu.vector_store %arg7[%76, %c0_28, %c0_29], %79 {strides = array<i32>} : memref<8x4x32xf32, #tpu.memory_space<vmem>>, vector<1x4x32xf32>,
    %c2_i32 = arith.constant 2 : i32
    %80 = arith.index_cast %c2_i32 : i32 to index
    %c0_30 = arith.constant 0 : index
    %c0_31 = arith.constant 0 : index
    %81 = vector.load %arg0[%80, %c0_30, %c0_31] : memref<8x4x16xf32, #tpu.memory_space<vmem>>, vector<1x4x16xf32>
    %82 = vector.shape_cast %81 : vector<1x4x16xf32> to vector<4x16xf32>
    %cst_32 = arith.constant dense<0.000000e+00> : vector<4x128xf32>
    %83 = tpu.matmul %82, %16, %cst_32 {dimension_numbers = #tpu.dot_dimension_numbers<[1], [0], [0], [1], [0, 0, 1, 1], [], []>} : vector<4x16xf32>, vector<16x128xf32>, vector<4x128xf32> -> vector<4x128xf32>
    %84 = arith.truncf %75 : vector<4x32xf32> to vector<4x32xbf16>
    %cst_33 = arith.constant dense<0.000000e+00> : vector<4x128xf32>
    %85 = tpu.matmul %84, %21, %cst_33 {dimension_numbers = #tpu.dot_dimension_numbers<[1], [0], [0], [1], [0, 0, 1, 1], [], []>} : vector<4x32xbf16>, vector<32x128xbf16>, vector<4x128xf32> -> vector<4x128xf32>
    %86 = arith.addf %83, %85 : vector<4x128xf32>
    %87 = vector.broadcast %12 : vector<1x128xf32> to vector<4x128xf32>
    %88 = arith.addf %86, %87 : vector<4x128xf32>
    %89 = math.tanh %88 : vector<4x128xf32>
    %cst_34 = arith.constant 5.000000e-01 : f32
    %90 = vector.broadcast %cst_34 : f32 to vector<4x128xf32>
    %91 = arith.mulf %90, %89 : vector<4x128xf32>
    %cst_35 = arith.constant 5.000000e-01 : f32
    %92 = vector.broadcast %cst_35 : f32 to vector<4x128xf32>
    %93 = arith.addf %91, %92 : vector<4x128xf32>
    %94 = vector.extract_strided_slice %93 {offsets = [0, 0], sizes = [4, 32], strides = [1, 1]} : vector<4x128xf32> to vector<4x32xf32>
    %95 = vector.extract_strided_slice %93 {offsets = [0, 32], sizes = [4, 32], strides = [1, 1]} : vector<4x128xf32> to vector<4x32xf32>
    %96 = vector.extract_strided_slice %89 {offsets = [0, 64], sizes = [4, 32], strides = [1, 1]} : vector<4x128xf32> to vector<4x32xf32>
    %97 = vector.extract_strided_slice %93 {offsets = [0, 96], sizes = [4, 32], strides = [1, 1]} : vector<4x128xf32> to vector<4x32xf32>
    %98 = arith.mulf %95, %73 : vector<4x32xf32>
    %99 = arith.mulf %94, %96 : vector<4x32xf32>
    %100 = arith.addf %98, %99 : vector<4x32xf32>
    %101 = math.tanh %100 : vector<4x32xf32>
    %102 = arith.mulf %97, %101 : vector<4x32xf32>
    %103 = arith.index_cast %c2_i32 : i32 to index
    %c0_36 = arith.constant 0 : index
    %c0_37 = arith.constant 0 : index
    %104 = vector.load %arg7[%103, %c0_36, %c0_37] : memref<8x4x32xf32, #tpu.memory_space<vmem>>, vector<1x4x32xf32>
    %105 = vector.shape_cast %104 : vector<1x4x32xf32> to vector<4x32xf32>
    %106 = vector.shape_cast %102 : vector<4x32xf32> to vector<1x4x32xf32>
    tpu.vector_store %arg7[%103, %c0_36, %c0_37], %106 {strides = array<i32>} : memref<8x4x32xf32, #tpu.memory_space<vmem>>, vector<1x4x32xf32>,
    %c3_i32 = arith.constant 3 : i32
    %107 = arith.index_cast %c3_i32 : i32 to index
    %c0_38 = arith.constant 0 : index
    %c0_39 = arith.constant 0 : index
    %108 = vector.load %arg0[%107, %c0_38, %c0_39] : memref<8x4x16xf32, #tpu.memory_space<vmem>>, vector<1x4x16xf32>
    %109 = vector.shape_cast %108 : vector<1x4x16xf32> to vector<4x16xf32>
    %cst_40 = arith.constant dense<0.000000e+00> : vector<4x128xf32>
    %110 = tpu.matmul %109, %16, %cst_40 {dimension_numbers = #tpu.dot_dimension_numbers<[1], [0], [0], [1], [0, 0, 1, 1], [], []>} : vector<4x16xf32>, vector<16x128xf32>, vector<4x128xf32> -> vector<4x128xf32>
    %111 = arith.truncf %102 : vector<4x32xf32> to vector<4x32xbf16>
    %cst_41 = arith.constant dense<0.000000e+00> : vector<4x128xf32>
    %112 = tpu.matmul %111, %21, %cst_41 {dimension_numbers = #tpu.dot_dimension_numbers<[1], [0], [0], [1], [0, 0, 1, 1], [], []>} : vector<4x32xbf16>, vector<32x128xbf16>, vector<4x128xf32> -> vector<4x128xf32>
    %113 = arith.addf %110, %112 : vector<4x128xf32>
    %114 = vector.broadcast %12 : vector<1x128xf32> to vector<4x128xf32>
    %115 = arith.addf %113, %114 : vector<4x128xf32>
    %116 = math.tanh %115 : vector<4x128xf32>
    %cst_42 = arith.constant 5.000000e-01 : f32
    %117 = vector.broadcast %cst_42 : f32 to vector<4x128xf32>
    %118 = arith.mulf %117, %116 : vector<4x128xf32>
    %cst_43 = arith.constant 5.000000e-01 : f32
    %119 = vector.broadcast %cst_43 : f32 to vector<4x128xf32>
    %120 = arith.addf %118, %119 : vector<4x128xf32>
    %121 = vector.extract_strided_slice %120 {offsets = [0, 0], sizes = [4, 32], strides = [1, 1]} : vector<4x128xf32> to vector<4x32xf32>
    %122 = vector.extract_strided_slice %120 {offsets = [0, 32], sizes = [4, 32], strides = [1, 1]} : vector<4x128xf32> to vector<4x32xf32>
    %123 = vector.extract_strided_slice %116 {offsets = [0, 64], sizes = [4, 32], strides = [1, 1]} : vector<4x128xf32> to vector<4x32xf32>
    %124 = vector.extract_strided_slice %120 {offsets = [0, 96], sizes = [4, 32], strides = [1, 1]} : vector<4x128xf32> to vector<4x32xf32>
    %125 = arith.mulf %122, %100 : vector<4x32xf32>
    %126 = arith.mulf %121, %123 : vector<4x32xf32>
    %127 = arith.addf %125, %126 : vector<4x32xf32>
    %128 = math.tanh %127 : vector<4x32xf32>
    %129 = arith.mulf %124, %128 : vector<4x32xf32>
    %130 = arith.index_cast %c3_i32 : i32 to index
    %c0_44 = arith.constant 0 : index
    %c0_45 = arith.constant 0 : index
    %131 = vector.load %arg7[%130, %c0_44, %c0_45] : memref<8x4x32xf32, #tpu.memory_space<vmem>>, vector<1x4x32xf32>
    %132 = vector.shape_cast %131 : vector<1x4x32xf32> to vector<4x32xf32>
    %133 = vector.shape_cast %129 : vector<4x32xf32> to vector<1x4x32xf32>
    tpu.vector_store %arg7[%130, %c0_44, %c0_45], %133 {strides = array<i32>} : memref<8x4x32xf32, #tpu.memory_space<vmem>>, vector<1x4x32xf32>,
    %c4_i32 = arith.constant 4 : i32
    %134 = arith.index_cast %c4_i32 : i32 to index
    %c0_46 = arith.constant 0 : index
    %c0_47 = arith.constant 0 : index
    %135 = vector.load %arg0[%134, %c0_46, %c0_47] : memref<8x4x16xf32, #tpu.memory_space<vmem>>, vector<1x4x16xf32>
    %136 = vector.shape_cast %135 : vector<1x4x16xf32> to vector<4x16xf32>
    %cst_48 = arith.constant dense<0.000000e+00> : vector<4x128xf32>
    %137 = tpu.matmul %136, %16, %cst_48 {dimension_numbers = #tpu.dot_dimension_numbers<[1], [0], [0], [1], [0, 0, 1, 1], [], []>} : vector<4x16xf32>, vector<16x128xf32>, vector<4x128xf32> -> vector<4x128xf32>
    %138 = arith.truncf %129 : vector<4x32xf32> to vector<4x32xbf16>
    %cst_49 = arith.constant dense<0.000000e+00> : vector<4x128xf32>
    %139 = tpu.matmul %138, %21, %cst_49 {dimension_numbers = #tpu.dot_dimension_numbers<[1], [0], [0], [1], [0, 0, 1, 1], [], []>} : vector<4x32xbf16>, vector<32x128xbf16>, vector<4x128xf32> -> vector<4x128xf32>
    %140 = arith.addf %137, %139 : vector<4x128xf32>
    %141 = vector.broadcast %12 : vector<1x128xf32> to vector<4x128xf32>
    %142 = arith.addf %140, %141 : vector<4x128xf32>
    %143 = math.tanh %142 : vector<4x128xf32>
    %cst_50 = arith.constant 5.000000e-01 : f32
    %144 = vector.broadcast %cst_50 : f32 to vector<4x128xf32>
    %145 = arith.mulf %144, %143 : vector<4x128xf32>
    %cst_51 = arith.constant 5.000000e-01 : f32
    %146 = vector.broadcast %cst_51 : f32 to vector<4x128xf32>
    %147 = arith.addf %145, %146 : vector<4x128xf32>
    %148 = vector.extract_strided_slice %147 {offsets = [0, 0], sizes = [4, 32], strides = [1, 1]} : vector<4x128xf32> to vector<4x32xf32>
    %149 = vector.extract_strided_slice %147 {offsets = [0, 32], sizes = [4, 32], strides = [1, 1]} : vector<4x128xf32> to vector<4x32xf32>
    %150 = vector.extract_strided_slice %143 {offsets = [0, 64], sizes = [4, 32], strides = [1, 1]} : vector<4x128xf32> to vector<4x32xf32>
    %151 = vector.extract_strided_slice %147 {offsets = [0, 96], sizes = [4, 32], strides = [1, 1]} : vector<4x128xf32> to vector<4x32xf32>
    %152 = arith.mulf %149, %127 : vector<4x32xf32>
    %153 = arith.mulf %148, %150 : vector<4x32xf32>
    %154 = arith.addf %152, %153 : vector<4x32xf32>
    %155 = math.tanh %154 : vector<4x32xf32>
    %156 = arith.mulf %151, %155 : vector<4x32xf32>
    %157 = arith.index_cast %c4_i32 : i32 to index
    %c0_52 = arith.constant 0 : index
    %c0_53 = arith.constant 0 : index
    %158 = vector.load %arg7[%157, %c0_52, %c0_53] : memref<8x4x32xf32, #tpu.memory_space<vmem>>, vector<1x4x32xf32>
    %159 = vector.shape_cast %158 : vector<1x4x32xf32> to vector<4x32xf32>
    %160 = vector.shape_cast %156 : vector<4x32xf32> to vector<1x4x32xf32>
    tpu.vector_store %arg7[%157, %c0_52, %c0_53], %160 {strides = array<i32>} : memref<8x4x32xf32, #tpu.memory_space<vmem>>, vector<1x4x32xf32>,
    %c5_i32 = arith.constant 5 : i32
    %161 = arith.index_cast %c5_i32 : i32 to index
    %c0_54 = arith.constant 0 : index
    %c0_55 = arith.constant 0 : index
    %162 = vector.load %arg0[%161, %c0_54, %c0_55] : memref<8x4x16xf32, #tpu.memory_space<vmem>>, vector<1x4x16xf32>
    %163 = vector.shape_cast %162 : vector<1x4x16xf32> to vector<4x16xf32>
    %cst_56 = arith.constant dense<0.000000e+00> : vector<4x128xf32>
    %164 = tpu.matmul %163, %16, %cst_56 {dimension_numbers = #tpu.dot_dimension_numbers<[1], [0], [0], [1], [0, 0, 1, 1], [], []>} : vector<4x16xf32>, vector<16x128xf32>, vector<4x128xf32> -> vector<4x128xf32>
    %165 = arith.truncf %156 : vector<4x32xf32> to vector<4x32xbf16>
    %cst_57 = arith.constant dense<0.000000e+00> : vector<4x128xf32>
    %166 = tpu.matmul %165, %21, %cst_57 {dimension_numbers = #tpu.dot_dimension_numbers<[1], [0], [0], [1], [0, 0, 1, 1], [], []>} : vector<4x32xbf16>, vector<32x128xbf16>, vector<4x128xf32> -> vector<4x128xf32>
    %167 = arith.addf %164, %166 : vector<4x128xf32>
    %168 = vector.broadcast %12 : vector<1x128xf32> to vector<4x128xf32>
    %169 = arith.addf %167, %168 : vector<4x128xf32>
    %170 = math.tanh %169 : vector<4x128xf32>
    %cst_58 = arith.constant 5.000000e-01 : f32
    %171 = vector.broadcast %cst_58 : f32 to vector<4x128xf32>
    %172 = arith.mulf %171, %170 : vector<4x128xf32>
    %cst_59 = arith.constant 5.000000e-01 : f32
    %173 = vector.broadcast %cst_59 : f32 to vector<4x128xf32>
    %174 = arith.addf %172, %173 : vector<4x128xf32>
    %175 = vector.extract_strided_slice %174 {offsets = [0, 0], sizes = [4, 32], strides = [1, 1]} : vector<4x128xf32> to vector<4x32xf32>
    %176 = vector.extract_strided_slice %174 {offsets = [0, 32], sizes = [4, 32], strides = [1, 1]} : vector<4x128xf32> to vector<4x32xf32>
    %177 = vector.extract_strided_slice %170 {offsets = [0, 64], sizes = [4, 32], strides = [1, 1]} : vector<4x128xf32> to vector<4x32xf32>
    %178 = vector.extract_strided_slice %174 {offsets = [0, 96], sizes = [4, 32], strides = [1, 1]} : vector<4x128xf32> to vector<4x32xf32>
    %179 = arith.mulf %176, %154 : vector<4x32xf32>
    %180 = arith.mulf %175, %177 : vector<4x32xf32>
    %181 = arith.addf %179, %180 : vector<4x32xf32>
    %182 = math.tanh %181 : vector<4x32xf32>
    %183 = arith.mulf %178, %182 : vector<4x32xf32>
    %184 = arith.index_cast %c5_i32 : i32 to index
    %c0_60 = arith.constant 0 : index
    %c0_61 = arith.constant 0 : index
    %185 = vector.load %arg7[%184, %c0_60, %c0_61] : memref<8x4x32xf32, #tpu.memory_space<vmem>>, vector<1x4x32xf32>
    %186 = vector.shape_cast %185 : vector<1x4x32xf32> to vector<4x32xf32>
    %187 = vector.shape_cast %183 : vector<4x32xf32> to vector<1x4x32xf32>
    tpu.vector_store %arg7[%184, %c0_60, %c0_61], %187 {strides = array<i32>} : memref<8x4x32xf32, #tpu.memory_space<vmem>>, vector<1x4x32xf32>,
    %c6_i32 = arith.constant 6 : i32
    %188 = arith.index_cast %c6_i32 : i32 to index
    %c0_62 = arith.constant 0 : index
    %c0_63 = arith.constant 0 : index
    %189 = vector.load %arg0[%188, %c0_62, %c0_63] : memref<8x4x16xf32, #tpu.memory_space<vmem>>, vector<1x4x16xf32>
    %190 = vector.shape_cast %189 : vector<1x4x16xf32> to vector<4x16xf32>
    %cst_64 = arith.constant dense<0.000000e+00> : vector<4x128xf32>
    %191 = tpu.matmul %190, %16, %cst_64 {dimension_numbers = #tpu.dot_dimension_numbers<[1], [0], [0], [1], [0, 0, 1, 1], [], []>} : vector<4x16xf32>, vector<16x128xf32>, vector<4x128xf32> -> vector<4x128xf32>
    %192 = arith.truncf %183 : vector<4x32xf32> to vector<4x32xbf16>
    %cst_65 = arith.constant dense<0.000000e+00> : vector<4x128xf32>
    %193 = tpu.matmul %192, %21, %cst_65 {dimension_numbers = #tpu.dot_dimension_numbers<[1], [0], [0], [1], [0, 0, 1, 1], [], []>} : vector<4x32xbf16>, vector<32x128xbf16>, vector<4x128xf32> -> vector<4x128xf32>
    %194 = arith.addf %191, %193 : vector<4x128xf32>
    %195 = vector.broadcast %12 : vector<1x128xf32> to vector<4x128xf32>
    %196 = arith.addf %194, %195 : vector<4x128xf32>
    %197 = math.tanh %196 : vector<4x128xf32>
    %cst_66 = arith.constant 5.000000e-01 : f32
    %198 = vector.broadcast %cst_66 : f32 to vector<4x128xf32>
    %199 = arith.mulf %198, %197 : vector<4x128xf32>
    %cst_67 = arith.constant 5.000000e-01 : f32
    %200 = vector.broadcast %cst_67 : f32 to vector<4x128xf32>
    %201 = arith.addf %199, %200 : vector<4x128xf32>
    %202 = vector.extract_strided_slice %201 {offsets = [0, 0], sizes = [4, 32], strides = [1, 1]} : vector<4x128xf32> to vector<4x32xf32>
    %203 = vector.extract_strided_slice %201 {offsets = [0, 32], sizes = [4, 32], strides = [1, 1]} : vector<4x128xf32> to vector<4x32xf32>
    %204 = vector.extract_strided_slice %197 {offsets = [0, 64], sizes = [4, 32], strides = [1, 1]} : vector<4x128xf32> to vector<4x32xf32>
    %205 = vector.extract_strided_slice %201 {offsets = [0, 96], sizes = [4, 32], strides = [1, 1]} : vector<4x128xf32> to vector<4x32xf32>
    %206 = arith.mulf %203, %181 : vector<4x32xf32>
    %207 = arith.mulf %202, %204 : vector<4x32xf32>
    %208 = arith.addf %206, %207 : vector<4x32xf32>
    %209 = math.tanh %208 : vector<4x32xf32>
    %210 = arith.mulf %205, %209 : vector<4x32xf32>
    %211 = arith.index_cast %c6_i32 : i32 to index
    %c0_68 = arith.constant 0 : index
    %c0_69 = arith.constant 0 : index
    %212 = vector.load %arg7[%211, %c0_68, %c0_69] : memref<8x4x32xf32, #tpu.memory_space<vmem>>, vector<1x4x32xf32>
    %213 = vector.shape_cast %212 : vector<1x4x32xf32> to vector<4x32xf32>
    %214 = vector.shape_cast %210 : vector<4x32xf32> to vector<1x4x32xf32>
    tpu.vector_store %arg7[%211, %c0_68, %c0_69], %214 {strides = array<i32>} : memref<8x4x32xf32, #tpu.memory_space<vmem>>, vector<1x4x32xf32>,
    %c7_i32 = arith.constant 7 : i32
    %215 = arith.index_cast %c7_i32 : i32 to index
    %c0_70 = arith.constant 0 : index
    %c0_71 = arith.constant 0 : index
    %216 = vector.load %arg0[%215, %c0_70, %c0_71] : memref<8x4x16xf32, #tpu.memory_space<vmem>>, vector<1x4x16xf32>
    %217 = vector.shape_cast %216 : vector<1x4x16xf32> to vector<4x16xf32>
    %cst_72 = arith.constant dense<0.000000e+00> : vector<4x128xf32>
    %218 = tpu.matmul %217, %16, %cst_72 {dimension_numbers = #tpu.dot_dimension_numbers<[1], [0], [0], [1], [0, 0, 1, 1], [], []>} : vector<4x16xf32>, vector<16x128xf32>, vector<4x128xf32> -> vector<4x128xf32>
    %219 = arith.truncf %210 : vector<4x32xf32> to vector<4x32xbf16>
    %cst_73 = arith.constant dense<0.000000e+00> : vector<4x128xf32>
    %220 = tpu.matmul %219, %21, %cst_73 {dimension_numbers = #tpu.dot_dimension_numbers<[1], [0], [0], [1], [0, 0, 1, 1], [], []>} : vector<4x32xbf16>, vector<32x128xbf16>, vector<4x128xf32> -> vector<4x128xf32>
    %221 = arith.addf %218, %220 : vector<4x128xf32>
    %222 = vector.broadcast %12 : vector<1x128xf32> to vector<4x128xf32>
    %223 = arith.addf %221, %222 : vector<4x128xf32>
    %224 = math.tanh %223 : vector<4x128xf32>
    %cst_74 = arith.constant 5.000000e-01 : f32
    %225 = vector.broadcast %cst_74 : f32 to vector<4x128xf32>
    %226 = arith.mulf %225, %224 : vector<4x128xf32>
    %cst_75 = arith.constant 5.000000e-01 : f32
    %227 = vector.broadcast %cst_75 : f32 to vector<4x128xf32>
    %228 = arith.addf %226, %227 : vector<4x128xf32>
    %229 = vector.extract_strided_slice %228 {offsets = [0, 0], sizes = [4, 32], strides = [1, 1]} : vector<4x128xf32> to vector<4x32xf32>
    %230 = vector.extract_strided_slice %228 {offsets = [0, 32], sizes = [4, 32], strides = [1, 1]} : vector<4x128xf32> to vector<4x32xf32>
    %231 = vector.extract_strided_slice %224 {offsets = [0, 64], sizes = [4, 32], strides = [1, 1]} : vector<4x128xf32> to vector<4x32xf32>
    %232 = vector.extract_strided_slice %228 {offsets = [0, 96], sizes = [4, 32], strides = [1, 1]} : vector<4x128xf32> to vector<4x32xf32>
    %233 = arith.mulf %230, %208 : vector<4x32xf32>
    %234 = arith.mulf %229, %231 : vector<4x32xf32>
    %235 = arith.addf %233, %234 : vector<4x32xf32>
    %236 = math.tanh %235 : vector<4x32xf32>
    %237 = arith.mulf %232, %236 : vector<4x32xf32>
    %238 = arith.index_cast %c7_i32 : i32 to index
    %c0_76 = arith.constant 0 : index
    %c0_77 = arith.constant 0 : index
    %239 = vector.load %arg7[%238, %c0_76, %c0_77] : memref<8x4x32xf32, #tpu.memory_space<vmem>>, vector<1x4x32xf32>
    %240 = vector.shape_cast %239 : vector<1x4x32xf32> to vector<4x32xf32>
    %241 = vector.shape_cast %237 : vector<4x32xf32> to vector<1x4x32xf32>
    tpu.vector_store %arg7[%238, %c0_76, %c0_77], %241 {strides = array<i32>} : memref<8x4x32xf32, #tpu.memory_space<vmem>>, vector<1x4x32xf32>,
    %c8_i32 = arith.constant 8 : i32
    %c0_78 = arith.constant 0 : index
    %c0_79 = arith.constant 0 : index
    %c0_80 = arith.constant 0 : index
    %242 = vector.load %arg8[%c0_78, %c0_79, %c0_80] : memref<1x4x32xf32, #tpu.memory_space<vmem>>, vector<1x4x32xf32>
    %243 = vector.shape_cast %242 : vector<1x4x32xf32> to vector<4x32xf32>
    %244 = vector.shape_cast %237 : vector<4x32xf32> to vector<1x4x32xf32>
    tpu.vector_store %arg8[%c0_78, %c0_79, %c0_80], %244 {strides = array<i32>} : memref<1x4x32xf32, #tpu.memory_space<vmem>>, vector<1x4x32xf32>,
    %c0_81 = arith.constant 0 : index
    %c0_82 = arith.constant 0 : index
    %c0_83 = arith.constant 0 : index
    %245 = vector.load %arg9[%c0_81, %c0_82, %c0_83] : memref<1x4x32xf32, #tpu.memory_space<vmem>>, vector<1x4x32xf32>
    %246 = vector.shape_cast %245 : vector<1x4x32xf32> to vector<4x32xf32>
    %247 = vector.shape_cast %235 : vector<4x32xf32> to vector<1x4x32xf32>
    tpu.vector_store %arg9[%c0_81, %c0_82, %c0_83], %247 {strides = array<i32>} : memref<1x4x32xf32, #tpu.memory_space<vmem>>, vector<1x4x32xf32>,
    return
  }
}

</mosaic_0001>

<bundles_post_ra>
// kernel: encoder_lstm_forward.1
= control target key start
LH: loop header
LB: loop body
LE: loop exit
PB: predicated region body
PF: predicated region fallthrough
CT: control target
= control target key end

     0   :  { %15 = vsyncpa [#allocation3], 0  ;;  %v1694_v6 = vmov 0.0   ;;  %s2104_s0 = inlined_call_operand.vmem [shape: f32[8,4,16], index: 0, kind: input, shape index: {}]   ;;  %s2105_s1 = inlined_call_operand.vmem [shape: f32[128,16], index: 1, kind: input, shape index: {}]   ;;  %s2106_s2 = inlined_call_operand.vmem [shape: f32[128,32], index: 2, kind: input, shape index: {}]   ;;  %s2107_s3 = inlined_call_operand.vmem [shape: f32[1,128], index: 3, kind: input, shape index: {}]   ;;  %s2108_s4 = inlined_call_operand.vmem [shape: f32[1,128], index: 4, kind: input, shape index: {}]   ;;  %s2109_s5 = inlined_call_operand.vmem [shape: f32[1,4,32], index: 5, kind: input, shape index: {}]   ;;  %s2110_s6 = inlined_call_operand.vmem [shape: f32[1,4,32], index: 6, kind: input, shape index: {}]   ;;  %s2111_s7 = inlined_call_operand.hbm [shape: f32[8,4,32], index: 7, kind: output, shape index: {0}]   ;;  %s2112_s8 = inlined_call_operand.hbm [shape: f32[1,4,32], index: 8, kind: output, shape index: {1}]   ;;  %s2113_s9 = inlined_call_operand.hbm [shape: f32[1,4,32], index: 9, kind: output, shape index: {2}]  }
   0x1   :  { %v92_v0 = vld [vmem:[%s2106_s2] sm:$0xff]  ;;  %v93_v2 = vld [vmem:[%s2106_s2 + $0x8] sm:$0xff]  ;;  %v94_v4 = vld [vmem:[%s2106_s2 + $0x10] sm:$0xff]  ;;  %1476 = vmatprep.subr.mxu1 %v1694_v6  ;;  %1468 = vmatprep.subr.bf16.mxu0 %v1694_v6 }
   0x2   :  { %v42_v1 = vld [vmem:[%s2105_s1] sm:$0xff]  ;;  %108 = vxpose.xlu0.b32.start [1/16] (narrow) %v92_v0, 32  ;;  %v43_v3 = vld [vmem:[%s2105_s1 + $0x8] sm:$0xff]  ;;  %v44_v5 = vld [vmem:[%s2105_s1 + $0x10] sm:$0xff] }
   0x3   :  { %58 = vxpose.xlu1.b32.start [1/16] (narrow) %v42_v1, 16  ;;  %v95_v7 = vld [vmem:[%s2106_s2 + $0x18] sm:$0xff] }
   0x4   :  { %v45_v8 = vld [vmem:[%s2105_s1 + $0x18] sm:$0xff] }
   0x6   :  { %109 = vxpose.xlu0.b32.cont [2/16] (narrow) %v93_v2, 32 }
   0x7   :  { %59 = vxpose.xlu1.b32.cont [2/16] (narrow) %v43_v3, 16 }
   0xa   :  { %110 = vxpose.xlu0.b32.cont [3/16] (narrow) %v94_v4, 32 }
   0xb   :  { %60 = vxpose.xlu1.b32.cont [3/16] (narrow) %v44_v5, 16 }
   0xc   :  { %16 = vsyncpa [#allocation5], 0  ;;  %v96_v9 = vld [vmem:[%s2106_s2 + $0x20] sm:$0xff]  ;;  %vm1695_vm0 = vmmov 0   ;;  %v97_v11 = vld [vmem:[%s2106_s2 + $0x28] sm:$0xff]  ;;  %s1696_s12 = smov 32   ;;  %v32_v34 = vlaneseq }
   0xd   :  { %v46_v10 = vld [vmem:[%s2105_s1 + $0x20] sm:$0xff]  ;;  %1480 = vmatprep.mubr.msk.f32.mxu1 %vm1695_vm0, %v1694_v6  ;;  %1472 = vmatprep.mubr.msk.bf16.mxu0 %vm1695_vm0, %v1694_v6  ;;  %v47_v12 = vld [vmem:[%s2105_s1 + $0x28] sm:$0xff]  ;;  %v98_v13 = vld [vmem:[%s2106_s2 + $0x30] sm:$0xff]  ;;  %v1697_v38 = vmov 0.5   ;;  %vm194_vm4 = vcmask 130048   ;;  %vm150_vm5 = vcmask 261120  }
   0xe   :  { %111 = vxpose.xlu0.b32.cont [4/16] (narrow) %v95_v7, 32  ;;  %v48_v14 = vld [vmem:[%s2105_s1 + $0x30] sm:$0xff]  ;;  %v99_v15 = vld [vmem:[%s2106_s2 + $0x38] sm:$0xff]  ;;  %v100_v17 = vld [vmem:[%s2106_s2 + $0x40] sm:$0xff]  ;;  %v33_v35 = vand.u32 127, %v32_v34  ;;  %v270_v62 = vshrl.u32 %v32_v34, 7 }
   0xf   :  { %61 = vxpose.xlu1.b32.cont [4/16] (narrow) %v45_v8, 16  ;;  %v49_v16 = vld [vmem:[%s2105_s1 + $0x38] sm:$0xff]  ;;  %v50_v18 = vld [vmem:[%s2105_s1 + $0x40] sm:$0xff]  ;;  %v101_v19 = vld [vmem:[%s2106_s2 + $0x48] sm:$0xff]  ;;  %vm303_vm6 = vcmask 257024   ;;  %s1700_s30 = smov [#allocation4]  }
  0x10   :  { %v51_v20 = vld [vmem:[%s2105_s1 + $0x48] sm:$0xff]  ;;  %v102_v21 = vld [vmem:[%s2106_s2 + $0x50] sm:$0xff]  ;;  %v103_v23 = vld [vmem:[%s2106_s2 + $0x58] sm:$0xff]  ;;  %vm34_vm1 = vcmp.ge.s32.totalorder %v33_v35, 64  ;;  %vm35_vm2 = vcmp.lt.s32.totalorder %v33_v35, 96  ;;  %v271_v0 = vsub.s32 0, %v270_v62 }
  0x11   :  { %v52_v22 = vld [vmem:[%s2105_s1 + $0x50] sm:$0xff]  ;;  %v53_v24 = vld [vmem:[%s2105_s1 + $0x58] sm:$0xff]  ;;  %v104_v25 = vld [vmem:[%s2106_s2 + $0x60] sm:$0xff]  ;;  %s1372_s10 = sshll.u32 %s1700_s30, 4  ;;  %s1701_s11 = smov [#allocation2]   ;;  %s1373_s10 = int_to_ptr.vmem [resolvable:$true] %s1372_s10 }
  0x12   :  { %112 = vxpose.xlu0.b32.cont [5/16] (narrow) %v96_v9, 32  ;;  %v54_v26 = vld [vmem:[%s2105_s1 + $0x60] sm:$0xff]  ;;  %v105_v27 = vld [vmem:[%s2106_s2 + $0x68] sm:$0xff]  ;;  %v106_v29 = vld [vmem:[%s2106_s2 + $0x70] sm:$0xff]  ;;  %p1635_p1 = scmp.lt.s32.totalorder %s1373_s10, %s1373_s10 }
  0x13   :  { %62 = vxpose.xlu1.b32.cont [5/16] (narrow) %v46_v10, 16  ;;  %v55_v28 = vld [vmem:[%s2105_s1 + $0x68] sm:$0xff]  ;;  %v56_v30 = vld [vmem:[%s2105_s1 + $0x70] sm:$0xff]  ;;  %v107_v31 = vld [vmem:[%s2106_s2 + $0x78] sm:$0xff]  ;;  %s1702_s2 = smov [#allocation6]  }
  0x14   :  { %v57_v32 = vld [vmem:[%s2105_s1 + $0x78] sm:$0xff]  ;;  %v147_v33 = vld [vmem:[%s2110_s6] sm:$0xf]  ;;  %vm36_vm3 = vmand %vm34_vm1, %vm35_vm2  ;;  %s1359_s1 = sshll.u32 %s1701_s11, 4  ;;  %s1630_s6 = scalar_lea.vmem %s1373_s10, 64  ;;  %s1360_s1 = int_to_ptr.vmem [resolvable:$true] %s1359_s1 }
  0x15   :  { %v37_v39 = vsel %vm36_vm3, 1.0, %v1697_v38  ;;  %v148_v44 = vld [vmem:[%s2104_s0] sm:$0xf]  ;;  %v1399_v55 = vld [vmem:[%s2104_s0 + $0x4] sm:$0xf]  ;;  %p1631_p0 = scmp.ne.s32.totalorder %s1373_s10, %s1630_s6  ;;  %p1636_p2 = scmp.lt.s32.totalorder %s1630_s6, %s1630_s6 }
  0x16   :  { %113 = vxpose.xlu0.b32.cont [6/16] (narrow) %v97_v11, 32  ;;  %v146_v52 = vld [vmem:[%s2109_s5] sm:$0xf]  ;;  %v1402_v56 = vld [vmem:[%s2104_s0 + $0x8] sm:$0xf] }
  0x17   :  { %63 = vxpose.xlu1.b32.cont [6/16] (narrow) %v47_v12, 16  ;;  %v149_v54 = vpack.c.bf16 %v146_v52, %v146_v52  ;;  %v38_v58 = vld [vmem:[%s2107_s3] sm:$0x1]  ;;  %s1698_s3 = smov 64   ;;  %p1637_p3 = por %p1636_p2, %p1635_p1 }
  0x18   :  { %v39_v59 = vld [vmem:[%s2108_s4] sm:$0x1] }
  0x19   :  { %v40_v61 = vadd.f32 %v39_v59, %v38_v58  ;;  %p1638_p4 = pnand %p1637_p3, %p1631_p0 }
  0x1a   :  { %114 = vxpose.xlu0.b32.cont [7/16] (narrow) %v98_v13, 32 }
  0x1b   :  { %64 = vxpose.xlu1.b32.cont [7/16] (narrow) %v48_v14, 16  ;;  %v41_v63 = vmul.f32 %v40_v61, %v37_v39 }
  0x1d   :  { %v1924_v1 = vrot.slane %v41_v63, %v271_v0 }
  0x1e   :  { %115 = vxpose.xlu0.b32.cont [8/16] (narrow) %v99_v15, 32 }
  0x1f   :  { %65 = vxpose.xlu1.b32.cont [8/16] (narrow) %v49_v16, 16 }
  0x22   :  { %116 = vxpose.xlu0.b32.cont [9/16] (narrow) %v100_v17, 32 }
  0x23   :  { %66 = vxpose.xlu1.b32.cont [9/16] (narrow) %v50_v18, 16 }
  0x26   :  { %117 = vxpose.xlu0.b32.cont [10/16] (narrow) %v101_v19, 32 }
  0x27   :  { %67 = vxpose.xlu1.b32.cont [10/16] (narrow) %v51_v20, 16 }
  0x2a   :  { %118 = vxpose.xlu0.b32.cont [11/16] (narrow) %v102_v21, 32 }
  0x2b   :  { %68 = vxpose.xlu1.b32.cont [11/16] (narrow) %v52_v22, 16 }
  0x2e   :  { %119 = vxpose.xlu0.b32.cont [12/16] (narrow) %v103_v23, 32 }
  0x2f   :  { %69 = vxpose.xlu1.b32.cont [12/16] (narrow) %v53_v24, 16 }
  0x32   :  { %120 = vxpose.xlu0.b32.cont [13/16] (narrow) %v104_v25, 32 }
  0x33   :  { %70 = vxpose.xlu1.b32.cont [13/16] (narrow) %v54_v26, 16 }
  0x36   :  { %121 = vxpose.xlu0.b32.cont [14/16] (narrow) %v105_v27, 32 }
  0x37   :  { %71 = vxpose.xlu1.b32.cont [14/16] (narrow) %v55_v28, 16 }
  0x3a   :  { %122 = vxpose.xlu0.b32.cont [15/16] (narrow) %v106_v29, 32 }
  0x3b   :  { %72 = vxpose.xlu1.b32.cont [15/16] (narrow) %v56_v30, 16 }
  0x3e   :  { %123 = vxpose.xlu0.b32.end [16/16] (narrow) %v107_v31, 32 }
  0x3f   :  { %73 = vxpose.xlu1.b32.end [16/16] (narrow) %v57_v32, 16 }
  0x5d   :  { %279 = vrot.lane.b32.xlu1 %v147_v33, %s1696_s12 }
  0x7e   :  { %v124_v36 = vpop.trf.xlu0 }
  0x7f   :  { %v74_v37 = vpop.trf.xlu1  ;;  %v140_v51 = vmul.f32 %v124_v36, %v37_v39 }
  0x80   :  { %v1861_v42 = vmul.f32 %v74_v37, %v37_v39 }
  0x82   :  { %v125_v40 = vpop.trf.xlu0 }
  0x83   :  { %v75_v41 = vpop.trf.xlu1  ;;  %v141_v49 = vmul.f32 %v125_v40, %v37_v39 }
  0x84   :  { %v1863_v43 = vmul.f32 %v75_v41, %v37_v39 }
  0x85   :  { %v1884_v53 = vpack.c.bf16 %v141_v49, %v140_v51  ;;  %v1408_v49 = vld [vmem:[%s2104_s0 + $0x10] sm:$0xf] }
  0x86   :  { %1477 = vmatpush3.msra.mxu1 %v1863_v43  ;;  %v126_v45 = vpop.trf.xlu0 }
  0x87   :  { %1478 = vmatprep.subr.mxu1 %v1694_v6  ;;  %v142_v47 = vmul.f32 %v126_v45, %v37_v39 }
  0x88   :  { %1479 = vmatpush3.msra.mxu1 %v1861_v42 }
  0x89   :  { %1483 = vmatprep.subr.bf16.mxu1 %v1694_v6  ;;  %1481 = vmatmul.mubr.msk.f32.vlgmr.msra.gmra.mxu1 %vm194_vm4, %v148_v44 }
  0x8a   :  { %1487 = vmatprep.mubr.msk.bf16.mxu1 %vm1695_vm0, %v1694_v6  ;;  %v127_v46 = vpop.trf.xlu0 }
  0x8b   :  { %v143_v48 = vmul.f32 %v127_v46, %v37_v39 }
  0x8d   :  { %v1875_v50 = vpack.c.bf16 %v143_v48, %v142_v47  ;;  %v1405_v48 = vld [vmem:[%s2104_s0 + $0xc] sm:$0xf] }
  0x8f   :  { %1469 = vmatpush3.bf16.msra.mxu0 %v1875_v50  ;;  %1484 = vmatpush3.bf16.msra.mxu1 %v1875_v50 }
  0x90   :  { %1470 = vmatprep.subr.bf16.mxu0 %v1694_v6  ;;  %1485 = vmatprep.subr.bf16.mxu1 %v1694_v6 }
  0x93   :  { %1471 = vmatpush3.bf16.msra.mxu0 %v1884_v53  ;;  %1486 = vmatpush3.bf16.msra.mxu1 %v1884_v53 }
  0x94   :  { %1491 = vmatprep.subr.mxu0 %v1694_v6  ;;  %1498 = vmatprep.subr.bf16.mxu1 %v1694_v6 }
  0x96   :  { %1473 = vmatmul.mubr.msk.bf16.vlgmr.msra.gmra.mxu0 %vm150_vm5, %v149_v54 }
  0x97   :  { %1492 = vmatpush3.msra.mxu0 %v1863_v43  ;;  %1495 = vmatprep.mubr.msk.f32.mxu0 %vm1695_vm0, %v1694_v6 }
  0x98   :  { %1493 = vmatprep.subr.mxu0 %v1694_v6 }
  0x99   :  { %1494 = vmatpush3.msra.mxu0 %v1861_v42 }
  0x9a   :  { %1506 = vmatprep.subr.mxu0 %v1694_v6 }
  0x9e   :  { %1496 = vmatmul.mubr.msk.f32.vlgmr.msra.gmra.mxu0 %vm194_vm4, %v1399_v55 }
  0x9f   :  { %1507 = vmatpush3.msra.mxu0 %v1863_v43  ;;  %1510 = vmatprep.mubr.msk.f32.mxu0 %vm1695_vm0, %v1694_v6 }
  0xa0   :  { %1508 = vmatprep.subr.mxu0 %v1694_v6 }
  0xa1   :  { %1509 = vmatpush3.msra.mxu0 %v1861_v42 }
  0xa2   :  { %1513 = vmatprep.subr.bf16.mxu0 %v1694_v6  ;;  %1511 = vmatmul.mubr.msk.f32.vlgmr.msra.gmra.mxu0 %vm194_vm4, %v1402_v56 }
  0xa3   :  { %1514 = vmatpush3.bf16.msra.mxu0 %v1875_v50  ;;  %1517 = vmatprep.mubr.msk.bf16.mxu0 %vm1695_vm0, %v1694_v6 }
  0xa4   :  { %1515 = vmatprep.subr.bf16.mxu0 %v1694_v6 }
  0xa7   :  { %1516 = vmatpush3.bf16.msra.mxu0 %v1884_v53 }
  0xa8   :  { %1528 = vmatprep.subr.bf16.mxu0 %v1694_v6 }
  0xcf   :  { %v280_v14 = vpop.permute.xlu1 %279 }
 0x149   :  { %v264_v57 = vpop.f32.mrf.mxu1 }
 0x14b   :  { %v1482_v60 = vpop.f32.mrf.mxu1 }
 0x156   :  { %v188_v2 = vpop.f32.mrf.mxu0 }
 0x157   :  { %v265_v3 = vadd.f32 %v264_v57, %v188_v2 }
 0x158   :  { %v1474_v4 = vpop.f32.mrf.mxu0 }
 0x159   :  { %v274_v5 = vadd.f32 %v1924_v1, %v265_v3 }
 0x15a   :  { %v191_v7 = vpop.f32.mrf.mxu0 }
 0x15b   :  { %1598 = vtanh.f32 %v274_v5 }
 0x15c   :  { %v1475_v8 = vpop.f32.mrf.mxu0 }
 0x15e   :  { %v423_v19 = vpop.f32.mrf.mxu0 }
 0x160   :  { %v1497_v20 = vpop.f32.mrf.mxu0 }
 0x162   :  { %v572_v45 = vpop.f32.mrf.mxu0 }
 0x164   :  { %v1512_v46 = vpop.f32.mrf.mxu0 }
 0x168   :  { %v1599_v9 = vpop.eup %1598 }
 0x169   :  { %284 = vrot.lane.b32.xlu0 %v1599_v9, %s1698_s3  ;;  %v276_v10 = vmul.f32 0.5, %v1599_v9 }
 0x16b   :  { %v277_v11 = vadd.f32 0.5, %v276_v10 }
 0x16d   :  { %v282_v15 = vmul.f32 %v280_v14, %v277_v11 }
 0x1db   :  { %v285_v12 = vpop.permute.xlu0 %284 }
 0x1dc   :  { %v287_v13 = vmul.f32 %v285_v12, %v277_v11 }
 0x1de   :  { %289 = vrot.lane.b32.xlu1 %v287_v13, %s1696_s12 }
 0x250   :  { %v290_v16 = vpop.permute.xlu1 %289 }
 0x251   :  { %v292_v17 = vadd.f32 %v290_v16, %v282_v15 }
 0x253   :  { %1600 = vtanh.f32 %v292_v17 }
 0x260   :  { %v1601_v18 = vpop.eup %1600 }
 0x261   :  { %295 = vrot.lane.b32.xlu1 %v1601_v18, %s1698_s3 }
 0x2d3   :  { %v296_v21 = vpop.permute.xlu1 %295 }
 0x2d4   :  { %v1930_v22 = vmul.f32 %v296_v21, %v277_v11 }
 0x2d6   :  { %v307_v23 = vpack.c.bf16 %v1930_v22, %v1930_v22 }
 0x2d8   :  { %309 = vrot.lane.b32.xlu1 %v307_v23, %s1696_s12 }
 0x34a   :  { %v310_v24 = vpop.permute.xlu1 %309 }
 0x34b   :  { %1488 = vmatmul.mubr.msk.bf16.vlgmr.msra.gmra.mxu1 %vm150_vm5, %v310_v24 }
 0x34c   :  { %1499 = vmatpush3.bf16.msra.mxu1 %v1875_v50  ;;  %1502 = vmatprep.mubr.msk.bf16.mxu1 %vm1695_vm0, %v1694_v6 }
 0x34d   :  { %1500 = vmatprep.subr.bf16.mxu1 %v1694_v6 }
 0x350   :  { %1501 = vmatpush3.bf16.msra.mxu1 %v1884_v53 }
 0x351   :  { %1521 = vmatprep.subr.mxu1 %v1694_v6 }
 0x40b   :  { %v348_v25 = vpop.f32.mrf.mxu1 }
 0x40c   :  { %v424_v26 = vadd.f32 %v423_v19, %v348_v25 }
 0x40d   :  { %v1489_v27 = vpop.f32.mrf.mxu1 }
 0x40e   :  { %v427_v28 = vadd.f32 %v424_v26, %v1924_v1 }
 0x40f   :  { %v351_v29 = vpop.f32.mrf.mxu1 }
 0x410   :  { %1602 = vtanh.f32 %v427_v28 }
 0x411   :  { %v1490_v30 = vpop.f32.mrf.mxu1 }
 0x41d   :  { %v1603_v31 = vpop.eup %1602 }
 0x41e   :  { %433 = vrot.lane.b32.xlu0 %v1603_v31, %s1698_s3  ;;  %v429_v32 = vmul.f32 0.5, %v1603_v31 }
 0x420   :  { %v430_v33 = vadd.f32 0.5, %v429_v32 }
 0x422   :  { %v431_v36 = vmul.f32 %v430_v33, %v292_v17 }
 0x490   :  { %v434_v34 = vpop.permute.xlu0 %433 }
 0x491   :  { %v436_v35 = vmul.f32 %v434_v34, %v430_v33  ;;  %v1414_v34 = vld [vmem:[%s2104_s0 + $0x18] sm:$0xf] }
 0x493   :  { %438 = vrot.lane.b32.xlu1 %v436_v35, %s1696_s12 }
 0x505   :  { %v439_v37 = vpop.permute.xlu1 %438 }
 0x506   :  { %v441_v38 = vadd.f32 %v439_v37, %v431_v36 }
 0x508   :  { %1604 = vtanh.f32 %v441_v38 }
 0x515   :  { %v1605_v39 = vpop.eup %1604 }
 0x516   :  { %444 = vrot.lane.b32.xlu0 %v1605_v39, %s1698_s3 }
 0x588   :  { %v445_v40 = vpop.permute.xlu0 %444 }
 0x589   :  { %v1946_v41 = vmul.f32 %v445_v40, %v430_v33  ;;  %v1411_v33 = vld [vmem:[%s2104_s0 + $0x14] sm:$0xf] }
 0x58b   :  { %v456_v44 = vpack.c.bf16 %v1946_v41, %v1946_v41 }
 0x58d   :  { %458 = vrot.lane.b32.xlu1 %v456_v44, %s1696_s12 }
 0x5ff   :  { %v459_v47 = vpop.permute.xlu1 %458 }
 0x600   :  { %1503 = vmatmul.mubr.msk.bf16.vlgmr.msra.gmra.mxu1 %vm150_vm5, %v459_v47 }
 0x601   :  { %1522 = vmatpush3.msra.mxu1 %v1863_v43  ;;  %1525 = vmatprep.mubr.msk.f32.mxu1 %vm1695_vm0, %v1694_v6 }
 0x602   :  { %1523 = vmatprep.subr.mxu1 %v1694_v6 }
 0x603   :  { %1524 = vmatpush3.msra.mxu1 %v1861_v42 }
 0x604   :  { %1536 = vmatprep.subr.mxu1 %v1694_v6 }
 0x608   :  { %1526 = vmatmul.mubr.msk.f32.vlgmr.msra.gmra.mxu1 %vm194_vm4, %v1405_v48 }
 0x609   :  { %1537 = vmatpush3.msra.mxu1 %v1863_v43  ;;  %1540 = vmatprep.mubr.msk.f32.mxu1 %vm1695_vm0, %v1694_v6 }
 0x60a   :  { %1538 = vmatprep.subr.mxu1 %v1694_v6 }
 0x60b   :  { %1539 = vmatpush3.msra.mxu1 %v1861_v42 }
 0x60c   :  { %1543 = vmatprep.subr.bf16.mxu1 %v1694_v6  ;;  %1541 = vmatmul.mubr.msk.f32.vlgmr.msra.gmra.mxu1 %vm194_vm4, %v1408_v49 }
 0x60d   :  { %1544 = vmatpush3.bf16.msra.mxu1 %v1875_v50  ;;  %1547 = vmatprep.mubr.msk.bf16.mxu1 %vm1695_vm0, %v1694_v6 }
 0x60e   :  { %1545 = vmatprep.subr.bf16.mxu1 %v1694_v6 }
 0x611   :  { %1546 = vmatpush3.bf16.msra.mxu1 %v1884_v53 }
 0x612   :  { %1558 = vmatprep.subr.bf16.mxu1 %v1694_v6 }
 0x6c0   :  { %v497_v51 = vpop.f32.mrf.mxu1 }
 0x6c1   :  { %v573_v52 = vadd.f32 %v572_v45, %v497_v51 }
 0x6c2   :  { %v1504_v54 = vpop.f32.mrf.mxu1 }
 0x6c3   :  { %v576_v55 = vadd.f32 %v573_v52, %v1924_v1 }
 0x6c4   :  { %v500_v56 = vpop.f32.mrf.mxu1 }
 0x6c5   :  { %1606 = vtanh.f32 %v576_v55 }
 0x6c6   :  { %v1505_v57 = vpop.f32.mrf.mxu1 }
 0x6c8   :  { %v721_v4 = vpop.f32.mrf.mxu1 }
 0x6ca   :  { %v1527_v5 = vpop.f32.mrf.mxu1 }
 0x6cc   :  { %v870_v30 = vpop.f32.mrf.mxu1 }
 0x6ce   :  { %v1542_v31 = vpop.f32.mrf.mxu1 }
 0x6d2   :  { %v1607_v58 = vpop.eup %1606 }
 0x6d3   :  { %582 = vrot.lane.b32.xlu0 %v1607_v58, %s1698_s3  ;;  %v578_v59 = vmul.f32 0.5, %v1607_v58 }
 0x6d5   :  { %v579_v60 = vadd.f32 0.5, %v578_v59 }
 0x6d7   :  { %v580_v63 = vmul.f32 %v579_v60, %v441_v38 }
 0x745   :  { %v583_v61 = vpop.permute.xlu0 %582 }
 0x746   :  { %v585_v62 = vmul.f32 %v583_v61, %v579_v60 }
 0x748   :  { %587 = vrot.lane.b32.xlu1 %v585_v62, %s1696_s12 }
 0x7ba   :  { %v588_v0 = vpop.permute.xlu1 %587 }
 0x7bb   :  { %v590_v2 = vadd.f32 %v588_v0, %v580_v63 }
 0x7bd   :  { %1608 = vtanh.f32 %v590_v2 }
 0x7ca   :  { %v1609_v3 = vpop.eup %1608 }
 0x7cb   :  { %593 = vrot.lane.b32.xlu0 %v1609_v3, %s1698_s3 }
 0x83d   :  { %v594_v7 = vpop.permute.xlu0 %593 }
 0x83e   :  { %v1982_v8 = vmul.f32 %v594_v7, %v579_v60 }
 0x840   :  { %v605_v9 = vpack.c.bf16 %v1982_v8, %v1982_v8 }
 0x842   :  { %607 = vrot.lane.b32.xlu1 %v605_v9, %s1696_s12 }
 0x8b4   :  { %v608_v10 = vpop.permute.xlu1 %607 }
 0x8b5   :  { %1518 = vmatmul.mubr.msk.bf16.vlgmr.msra.gmra.mxu0 %vm150_vm5, %v608_v10 }
 0x8b6   :  { %1529 = vmatpush3.bf16.msra.mxu0 %v1875_v50  ;;  %1532 = vmatprep.mubr.msk.bf16.mxu0 %vm1695_vm0, %v1694_v6 }
 0x8b7   :  { %1530 = vmatprep.subr.bf16.mxu0 %v1694_v6 }
 0x8ba   :  { %1531 = vmatpush3.bf16.msra.mxu0 %v1884_v53 }
 0x8bb   :  { %1551 = vmatprep.subr.mxu0 %v1694_v6 }
 0x975   :  { %v646_v11 = vpop.f32.mrf.mxu0 }
 0x976   :  { %v722_v12 = vadd.f32 %v721_v4, %v646_v11 }
 0x977   :  { %v1519_v13 = vpop.f32.mrf.mxu0 }
 0x978   :  { %v725_v14 = vadd.f32 %v722_v12, %v1924_v1 }
 0x979   :  { %v649_v15 = vpop.f32.mrf.mxu0 }
 0x97a   :  { %1610 = vtanh.f32 %v725_v14 }
 0x97b   :  { %v1520_v16 = vpop.f32.mrf.mxu0 }
 0x987   :  { %v1611_v17 = vpop.eup %1610 }
 0x988   :  { %731 = vrot.lane.b32.xlu0 %v1611_v17, %s1698_s3  ;;  %v727_v18 = vmul.f32 0.5, %v1611_v17 }
 0x98a   :  { %v728_v19 = vadd.f32 0.5, %v727_v18 }
 0x98c   :  { %v729_v23 = vmul.f32 %v728_v19, %v590_v2 }
 0x9fa   :  { %v732_v20 = vpop.permute.xlu0 %731 }
 0x9fb   :  { %v734_v21 = vmul.f32 %v732_v20, %v728_v19 }
 0x9fd   :  { %736 = vrot.lane.b32.xlu1 %v734_v21, %s1696_s12 }
 0xa6f   :  { %v737_v24 = vpop.permute.xlu1 %736 }
 0xa70   :  { %v739_v25 = vadd.f32 %v737_v24, %v729_v23 }
 0xa72   :  { %1612 = vtanh.f32 %v739_v25 }
 0xa7f   :  { %v1613_v26 = vpop.eup %1612 }
 0xa80   :  { %742 = vrot.lane.b32.xlu0 %v1613_v26, %s1698_s3 }
 0xaf2   :  { %v743_v27 = vpop.permute.xlu0 %742 }
 0xaf3   :  { %v1998_v28 = vmul.f32 %v743_v27, %v728_v19 }
 0xaf5   :  { %v754_v29 = vpack.c.bf16 %v1998_v28, %v1998_v28 }
 0xaf7   :  { %756 = vrot.lane.b32.xlu1 %v754_v29, %s1696_s12 }
 0xb69   :  { %v757_v32 = vpop.permute.xlu1 %756 }
 0xb6a   :  { %1533 = vmatmul.mubr.msk.bf16.vlgmr.msra.gmra.mxu0 %vm150_vm5, %v757_v32  ;;  %v1417_v32 = vld [vmem:[%s2104_s0 + $0x1c] sm:$0xf]  ;;  %s1699_s0 = smov 96  }
 0xb6b   :  { %1552 = vmatpush3.msra.mxu0 %v1863_v43  ;;  %1555 = vmatprep.mubr.msk.f32.mxu0 %vm1695_vm0, %v1694_v6 }
 0xb6c   :  { %1553 = vmatprep.subr.mxu0 %v1694_v6 }
 0xb6d   :  { %1554 = vmatpush3.msra.mxu0 %v1861_v42 }
 0xb6e   :  { %1566 = vmatprep.subr.mxu0 %v1694_v6 }
 0xb72   :  { %1556 = vmatmul.mubr.msk.f32.vlgmr.msra.gmra.mxu0 %vm194_vm4, %v1411_v33 }
 0xb73   :  { %1567 = vmatpush3.msra.mxu0 %v1863_v43  ;;  %1570 = vmatprep.mubr.msk.f32.mxu0 %vm1695_vm0, %v1694_v6 }
 0xb74   :  { %1568 = vmatprep.subr.mxu0 %v1694_v6 }
 0xb75   :  { %1569 = vmatpush3.msra.mxu0 %v1861_v42 }
 0xb76   :  { %1573 = vmatprep.subr.bf16.mxu0 %v1694_v6  ;;  %1571 = vmatmul.mubr.msk.f32.vlgmr.msra.gmra.mxu0 %vm194_vm4, %v1414_v34 }
 0xb77   :  { %1574 = vmatpush3.bf16.msra.mxu0 %v1875_v50  ;;  %1577 = vmatprep.mubr.msk.bf16.mxu0 %vm1695_vm0, %v1694_v6 }
 0xb78   :  { %1575 = vmatprep.subr.bf16.mxu0 %v1694_v6 }
 0xb7b   :  { %1576 = vmatpush3.bf16.msra.mxu0 %v1884_v53 }
 0xc2a   :  { %v795_v35 = vpop.f32.mrf.mxu0 }
 0xc2b   :  { %v871_v36 = vadd.f32 %v870_v30, %v795_v35 }
 0xc2c   :  { %v1534_v37 = vpop.f32.mrf.mxu0 }
 0xc2d   :  { %v874_v38 = vadd.f32 %v871_v36, %v1924_v1 }
 0xc2e   :  { %v798_v39 = vpop.f32.mrf.mxu0 }
 0xc2f   :  { %1614 = vtanh.f32 %v874_v38 }
 0xc30   :  { %v1535_v40 = vpop.f32.mrf.mxu0 }
 0xc32   :  { %v1019_v55 = vpop.f32.mrf.mxu0 }
 0xc34   :  { %v1557_v56 = vpop.f32.mrf.mxu0 }
 0xc36   :  { %v1168_v13 = vpop.f32.mrf.mxu0 }
 0xc38   :  { %v1572_v14 = vpop.f32.mrf.mxu0 }
 0xc3c   :  { %v1615_v44 = vpop.eup %1614 }
 0xc3d   :  { %880 = vrot.lane.b32.xlu0 %v1615_v44, %s1698_s3  ;;  %v876_v45 = vmul.f32 0.5, %v1615_v44 }
 0xc3f   :  { %v877_v46 = vadd.f32 0.5, %v876_v45 }
 0xc41   :  { %v878_v49 = vmul.f32 %v877_v46, %v739_v25 }
 0xcaf   :  { %v881_v47 = vpop.permute.xlu0 %880 }
 0xcb0   :  { %v883_v48 = vmul.f32 %v881_v47, %v877_v46 }
 0xcb2   :  { %885 = vrot.lane.b32.xlu1 %v883_v48, %s1696_s12 }
 0xd24   :  { %v886_v51 = vpop.permute.xlu1 %885 }
 0xd25   :  { %v888_v52 = vadd.f32 %v886_v51, %v878_v49 }
 0xd27   :  { %1616 = vtanh.f32 %v888_v52 }
 0xd34   :  { %v1617_v54 = vpop.eup %1616 }
 0xd35   :  { %891 = vrot.lane.b32.xlu0 %v1617_v54, %s1698_s3 }
 0xda7   :  { %v892_v57 = vpop.permute.xlu0 %891 }
 0xda8   :  { %v2033_v58 = vmul.f32 %v892_v57, %v877_v46 }
 0xdaa   :  { %v903_v59 = vpack.c.bf16 %v2033_v58, %v2033_v58 }
 0xdac   :  { %905 = vrot.lane.b32.xlu1 %v903_v59, %s1696_s12 }
 0xe1e   :  { %v906_v60 = vpop.permute.xlu1 %905 }
 0xe1f   :  { %1548 = vmatmul.mubr.msk.bf16.vlgmr.msra.gmra.mxu1 %vm150_vm5, %v906_v60 }
 0xe20   :  { %1559 = vmatpush3.bf16.msra.mxu1 %v1875_v50  ;;  %1562 = vmatprep.mubr.msk.bf16.mxu1 %vm1695_vm0, %v1694_v6 }
 0xe21   :  { %1560 = vmatprep.subr.bf16.mxu1 %v1694_v6 }
 0xe24   :  { %1561 = vmatpush3.bf16.msra.mxu1 %v1884_v53 }
 0xe25   :  { %1581 = vmatprep.subr.mxu1 %v1694_v6 }
 0xedf   :  { %v944_v61 = vpop.f32.mrf.mxu1 }
 0xee0   :  { %v1020_v62 = vadd.f32 %v1019_v55, %v944_v61 }
 0xee1   :  { %v1549_v63 = vpop.f32.mrf.mxu1 }
 0xee2   :  { %v1023_v0 = vadd.f32 %v1020_v62, %v1924_v1 }
 0xee3   :  { %v947_v2 = vpop.f32.mrf.mxu1 }
 0xee4   :  { %1618 = vtanh.f32 %v1023_v0 }
 0xee5   :  { %v1550_v3 = vpop.f32.mrf.mxu1 }
 0xef1   :  { %v1619_v4 = vpop.eup %1618 }
 0xef2   :  { %1029 = vrot.lane.b32.xlu0 %v1619_v4, %s1698_s3  ;;  %v1025_v50 = vmul.f32 0.5, %v1619_v4 }
 0xef4   :  { %v1026_v5 = vadd.f32 0.5, %v1025_v50 }
 0xef6   :  { %v1027_v53 = vmul.f32 %v1026_v5, %v888_v52 }
 0xf64   :  { %v1030_v7 = vpop.permute.xlu0 %1029 }
 0xf65   :  { %v1032_v9 = vmul.f32 %v1030_v7, %v1026_v5 }
 0xf67   :  { %1034 = vrot.lane.b32.xlu1 %v1032_v9, %s1696_s12 }
 0xfd9   :  { %v1035_v10 = vpop.permute.xlu1 %1034 }
 0xfda   :  { %v1037_v11 = vadd.f32 %v1035_v10, %v1027_v53 }
 0xfdc   :  { %1620 = vtanh.f32 %v1037_v11 }
 0xfe9   :  { %v1621_v12 = vpop.eup %1620 }
 0xfea   :  { %1040 = vrot.lane.b32.xlu0 %v1621_v12, %s1698_s3 }
0x105c   :  { %v1041_v15 = vpop.permute.xlu0 %1040 }
0x105d   :  { %v1043_v16 = vmul.f32 %v1041_v15, %v1026_v5 }
0x105f   :  { %v1052_v17 = vpack.c.bf16 %v1043_v16, %v1043_v16 }
0x1061   :  { %1054 = vrot.lane.b32.xlu1 %v1052_v17, %s1696_s12 }
0x10d3   :  { %v1055_v18 = vpop.permute.xlu1 %1054 }
0x10d4   :  { %1563 = vmatmul.mubr.msk.bf16.vlgmr.msra.gmra.mxu1 %vm150_vm5, %v1055_v18 }
0x10d5   :  { %1582 = vmatpush3.msra.mxu1 %v1863_v43  ;;  %1585 = vmatprep.mubr.msk.f32.mxu1 %vm1695_vm0, %v1694_v6 }
0x10d6   :  { %1583 = vmatprep.subr.mxu1 %v1694_v6 }
0x10d7   :  { %1584 = vmatpush3.msra.mxu1 %v1861_v42 }
0x10dc   :  { %1586 = vmatmul.mubr.msk.f32.vlgmr.msra.gmra.mxu1 %vm194_vm4, %v1417_v32 }
0x1194   :  { %v1093_v19 = vpop.f32.mrf.mxu1 }
0x1195   :  { %v1169_v20 = vadd.f32 %v1168_v13, %v1093_v19 }
0x1196   :  { %v1564_v21 = vpop.f32.mrf.mxu1 }
0x1197   :  { %v1172_v23 = vadd.f32 %v1169_v20, %v1924_v1 }
0x1198   :  { %v1096_v24 = vpop.f32.mrf.mxu1 }
0x1199   :  { %1622 = vtanh.f32 %v1172_v23 }
0x119a   :  { %v1565_v25 = vpop.f32.mrf.mxu1 }
0x119c   :  { %v1317_v37 = vpop.f32.mrf.mxu1 }
0x119e   :  { %v1587_v38 = vpop.f32.mrf.mxu1 }
0x11a6   :  { %v1623_v26 = vpop.eup %1622 }
0x11a7   :  { %1178 = vrot.lane.b32.xlu0 %v1623_v26, %s1698_s3  ;;  %v1174_v27 = vmul.f32 0.5, %v1623_v26 }
0x11a9   :  { %v1175_v43 = vadd.f32 0.5, %v1174_v27 }
0x11ab   :  { %v1176_v6 = vmul.f32 %v1175_v43, %v1037_v11 }
0x1219   :  { %v1179_v29 = vpop.permute.xlu0 %1178 }
0x121a   :  { %v1181_v30 = vmul.f32 %v1179_v29, %v1175_v43 }
0x121c   :  { %1183 = vrot.lane.b32.xlu1 %v1181_v30, %s1696_s12 }
0x128e   :  { %v1184_v31 = vpop.permute.xlu1 %1183 }
0x128f   :  { %v1186_v42 = vadd.f32 %v1184_v31, %v1176_v6 }
0x1291   :  { %1624 = vtanh.f32 %v1186_v42 }
0x129e   :  { %v1625_v33 = vpop.eup %1624 }
0x129f   :  { %1189 = vrot.lane.b32.xlu0 %v1625_v33, %s1698_s3 }
0x1311   :  { %v1190_v34 = vpop.permute.xlu0 %1189 }
0x1312   :  { %v1192_v35 = vmul.f32 %v1190_v34, %v1175_v43 }
0x1314   :  { %v1201_v36 = vpack.c.bf16 %v1192_v35, %v1192_v35 }
0x1316   :  { %1203 = vrot.lane.b32.xlu1 %v1201_v36, %s1696_s12 }
0x1388   :  { %v1204_v39 = vpop.permute.xlu1 %1203 }
0x1389   :  { %1578 = vmatmul.mubr.msk.bf16.vlgmr.msra.gmra.mxu0 %vm150_vm5, %v1204_v39 }
0x1449   :  { %v1242_v40 = vpop.f32.mrf.mxu0 }
0x144a   :  { %v1318_v44 = vadd.f32 %v1317_v37, %v1242_v40 }
0x144b   :  { %v1579_v45 = vpop.f32.mrf.mxu0 }
0x144c   :  { %v1321_v46 = vadd.f32 %v1318_v44, %v1924_v1 }
0x144d   :  { %v1245_v47 = vpop.f32.mrf.mxu0 }
0x144e   :  { %1626 = vtanh.f32 %v1321_v46 }
0x144f   :  { %v1580_v48 = vpop.f32.mrf.mxu0 }
0x145b   :  { %v1627_v49 = vpop.eup %1626 }
0x145c   :  { %1327 = vrot.lane.b32.xlu0 %v1627_v49, %s1698_s3  ;;  %v1323_v51 = vmul.f32 0.5, %v1627_v49 }
0x145e   :  { %v1324_v52 = vadd.f32 0.5, %v1323_v51 }
0x1460   :  { %v1325_v1 = vmul.f32 %v1324_v52, %v1186_v42 }
0x14ce   :  { %v1328_v54 = vpop.permute.xlu0 %1327 }
0x14cf   :  { %v1330_v55 = vmul.f32 %v1328_v54, %v1324_v52 }
0x14d1   :  { %1332 = vrot.lane.b32.xlu1 %v1330_v55, %s1696_s12 }
0x14d5   :  { %449 = vrot.lane.b32.xlu1 %v1946_v41, %s1696_s12 }
0x14d9   :  { %747 = vrot.lane.b32.xlu1 %v1998_v28, %s1696_s12 }
0x14dd   :  { %1045 = vrot.lane.b32.xlu1 %v1043_v16, %s1696_s12 }
0x1543   :  { %v1333_v56 = vpop.permute.xlu1 %1332 }
0x1544   :  { %v1335_v57 = vadd.f32 %v1333_v56, %v1325_v1 }
0x1546   :  { %1628 = vtanh.f32 %v1335_v57 }
0x1547   :  { %v450_v59 = vpop.permute.xlu1 %449 }
0x1548   :  { %453 = vst.msk [vmem:[#allocation2 + $0x4] sm:$0xf] %vm303_vm6, %v450_v59 }
0x154b   :  { %v748_v60 = vpop.permute.xlu1 %747 }
0x154c   :  { %751 = vst.msk [vmem:[#allocation2 + $0xc] sm:$0xf] %vm303_vm6, %v748_v60 }
0x154f   :  { %v1046_v61 = vpop.permute.xlu1 %1045 }
0x1550   :  { %1049 = vst.msk [vmem:[#allocation2 + $0x14] sm:$0xf] %vm303_vm6, %v1046_v61 }
0x1553   :  { %v1629_v41 = vpop.eup %1628 }
0x1554   :  { %1338 = vrot.lane.b32.xlu0 %v1629_v41, %s1698_s3 }
0x1558   :  { %300 = vrot.lane.b32.xlu0 %v1930_v22, %s1696_s12 }
0x155c   :  { %598 = vrot.lane.b32.xlu0 %v1982_v8, %s1696_s12 }
0x1560   :  { %896 = vrot.lane.b32.xlu0 %v2033_v58, %s1696_s12 }
0x1564   :  { %1194 = vrot.lane.b32.xlu0 %v1192_v35, %s1696_s12 }
0x15c6   :  { %v1339_v28 = vpop.permute.xlu0 %1338 }
0x15c7   :  { %v1341_v62 = vmul.f32 %v1339_v28, %v1324_v52 }
0x15c9   :  { %1343 = vrot.lane.b32.xlu1 %v1341_v62, %s1696_s12  ;;  %s1382_s12 = sshll.u32 %s1702_s2, 4  ;;  %s1383_s12 = int_to_ptr.vmem [resolvable:$true] %s1382_s12 }
0x15ca   :  { %v301_v63 = vpop.permute.xlu0 %300 }
0x15cb   :  { %304 = vst.msk [vmem:[#allocation2] sm:$0xf] %vm303_vm6, %v301_v63 }
0x15cd   :  { %1350 = vrot.lane.b32.xlu1 %v1335_v57, %s1699_s0 }
0x15ce   :  { %v599_v0 = vpop.permute.xlu0 %598 }
0x15cf   :  { %602 = vst.msk [vmem:[#allocation2 + $0x8] sm:$0xf] %vm303_vm6, %v599_v0 }
0x15d2   :  { %v897_v22 = vpop.permute.xlu0 %896 }
0x15d3   :  { %900 = vst.msk [vmem:[#allocation2 + $0x10] sm:$0xf] %vm303_vm6, %v897_v22 }
0x15d6   :  { %v1195_v8 = vpop.permute.xlu0 %1194 }
0x15d7   :  { %1198 = vst.msk [vmem:[#allocation2 + $0x18] sm:$0xf] %vm303_vm6, %v1195_v8 }
0x163b   :  { %v1344_v58 = vpop.permute.xlu1 %1343 }
0x163c   :  { %1347 = vst.msk [vmem:[#allocation2 + $0x1c] sm:$0xf] %vm303_vm6, %v1344_v58  ;;  %1348 = vst.msk [vmem:[#allocation4] sm:$0xf] %vm303_vm6, %v1344_v58 }
0x163d   :  { %1641 = shalt.err (!%p1638_p4)
}
0x163e   :  { %1375 = dma.vmem_to_hbm [thread:$0]  %s1373_s10, 64, %s2112_s8, [#allocation5]  }
0x163f   :  { %s1650_s14 = scalar_lea.vmem %s1360_s1, 512  ;;  %p1655_p6 = scmp.lt.s32.totalorder %s1360_s1, %s1360_s1 }
0x1640   :  { %p1651_p5 = scmp.ne.s32.totalorder %s1360_s1, %s1650_s14  ;;  %p1656_p7 = scmp.lt.s32.totalorder %s1650_s14, %s1650_s14 }
0x1642   :  { %p1657_p8 = por %p1656_p7, %p1655_p6 }
0x1644   :  { %p1658_p9 = pnand %p1657_p8, %p1651_p5 }
0x1646   :  { %1661 = shalt.err (!%p1658_p9)
}
0x1647   :  { %s1703_s15 = smov 4   ;;  %v1351_v2 = vpop.permute.xlu1 %1350  ;;  %s1670_s18 = scalar_lea.vmem %s1383_s12, 64 }
0x1648   :  { %1365 = dma.vmem_to_hbm [thread:$0]  %s1360_s1, 512, %s2111_s7, [#allocation3], %s1698_s3, %s1698_s3, %s1703_s15   ;;  %1353 = vst.msk [vmem:[#allocation6] sm:$0xf] %vm303_vm6, %v1351_v2 }
0x1649   :  { %p1671_p10 = scmp.ne.s32.totalorder %s1383_s12, %s1670_s18  ;;  %p1675_p11 = scmp.lt.s32.totalorder %s1383_s12, %s1383_s12 }
0x164a   :  { %p1676_p12 = scmp.lt.s32.totalorder %s1670_s18, %s1670_s18 }
0x164c   :  { %p1677_p13 = por %p1676_p12, %p1675_p11 }
0x164e   :  { %p1678_p0 = pnand %p1677_p13, %p1671_p10 }
0x1650   :  { %1681 = shalt.err (!%p1678_p0)
}
0x1651   :  { %1385 = dma.vmem_to_hbm [thread:$0]  %s1383_s12, 64, %s2113_s9, [#allocation5]  }
0x1652   :  { %1690 = dma.done.wait [#allocation3], 512  }
0x1653   :  { %1691 = vsyncadd [#allocation3], 4294966784 }
0x1654   :  { %1692 = dma.done.wait [#allocation5], 128  }
0x1655   :  { %1693 = vsyncadd [#allocation5], 4294967168 }
0x1656   :  { %1395 = vsyncpa [#allocation3], 1 }
0x1657   :  { %1396 = vsyncpa [#allocation5], 1 }

</bundles_post_ra>
